<compile_context>
chip_gen: v7x
topology: tpu7x:2x2x1
jax: 0.10.0
libtpu: 0.0.40
codegen_flags: <defaults>
</compile_context>

<pallas_src>
import jax
import jax.numpy as jnp
from jax.experimental import pallas as pl
from jax.experimental.pallas import tpu as pltpu


def _round_up(x, m):
    return ((x + m - 1) // m) * m


def _sublane_mult(itemsize):
    # Sublane tile: 8 rows for 4-byte dtypes, 16 for 2-byte, 32 for 1-byte.
    return 8 * max(4 // max(itemsize, 1), 1)


# ----------------------------- in-kernel helpers -----------------------------


def _fold_field_sum(x, n_fields, emb):
    """Sum a lane-packed (rows, n_fields*emb) f32 value over the field axis.

    Lane-folding tree: each step adds two contiguous half-width slices, so the
    VPU works on (mostly) full-width vregs. Handles any static n_fields (odd
    residues are peeled into `extra`).
    """
    extra = None
    while n_fields > 1:
        if n_fields % 2 == 1:
            tail = x[:, (n_fields - 1) * emb: n_fields * emb]
            extra = tail if extra is None else extra + tail
            n_fields -= 1
        half = n_fields // 2
        x = x[:, : half * emb] + x[:, half * emb: n_fields * emb]
        n_fields = half
    return x if extra is None else x + extra


def _make_fm_kernel(F, E, g, f_chunk):
    """FM kernel over a lane-dense block.

    x_ref: (tb, g*F*E)  -- g batch rows packed per stored row, fields lane-major
    o_ref: (tb, g*E)    -- lane-dense output (g*E == 128 when packing is active)
    """

    def kernel(x_ref, o_ref):
        for j in range(g):                      # static unroll over packed rows
            base = j * F * E
            s = None
            q = None
            for f0 in range(0, F, f_chunk):     # chunked: bounded live f32 data
                fc = min(f_chunk, F - f0)
                lo = base + f0 * E
                hi = base + (f0 + fc) * E
                v = x_ref[:, lo:hi].astype(jnp.float32)   # (tb, fc*E), f32 accum
                cs = _fold_field_sum(v, fc, E)             # sum_f x
                cq = _fold_field_sum(v * v, fc, E)         # sum_f x*x
                s = cs if s is None else s + cs
                q = cq if q is None else q + cq
            o_ref[:, j * E:(j + 1) * E] = (0.5 * (s * s - q)).astype(o_ref.dtype)

    return kernel


# ----------------------------- wrapper ----------------------------------------


def _pick_field_chunk(F, E, tb):
    """Fields per in-kernel chunk: keep one chunk's f32 working set ~<= 1 MiB so
    big-F / big-tile cases never materialize a full f32 copy of the tile."""
    budget_lanes = (1 << 20) // max(4 * tb, 1)
    lanes = max(E, min(512, budget_lanes))
    return max(1, min(F, lanes // E))


def _derive_rows_per_block(rows_total, padded_row_bytes, mult, requested,
                           target_bytes=4 << 20, max_bytes=8 << 20):
    """Rows (of the flattened lane-dense view) per grid block."""
    if requested is not None:
        tb = max(1, min(int(requested), rows_total))
    else:
        tb = max(1, int(target_bytes // padded_row_bytes))
        # Keep >= 2 grid steps when the batch allows it (two-TensorCore parts).
        tb = min(tb, _round_up(max(1, -(-rows_total // 2)), mult))
    # Hard per-buffer VMEM cap (also guards user-supplied batch_tile).
    cap = max(mult, (int(max_bytes // padded_row_bytes) // mult) * mult)
    tb = min(tb, cap)
    if tb >= rows_total:
        return rows_total
    if rows_total <= mult:
        return rows_total
    return max(mult, (tb // mult) * mult)


def fm_forward(x, *, batch_tile=None):
    """FM pairwise interaction. x: (B, F, E) -> (B, E) (input dtype, f32 accum)."""
    B, F, E = x.shape
    itemsize = jnp.dtype(x.dtype).itemsize
    mult = _sublane_mult(itemsize)

    # Lane-dense output packing: g batch rows per stored output row so the
    # stored last dim is 128 lanes (unmasked stores). Falls back to g=1 when E
    # doesn't divide 128 or B isn't divisible by g; the input side stays
    # lane-dense (last dim F*E) either way, which is the dominant traffic term.
    # TODO(synk): E values that don't divide 128 could also be packed via a
    # zero-padded E, at the cost of an extra HBM copy outside the kernel.
    g = 1
    if E < 128 and 128 % E == 0:
        cand = min(128 // E, 16)
        if cand > 1 and B % cand == 0:
            g = cand

    Bp = B // g
    W = g * F * E                      # lane-dense block width
    out_w = g * E
    x2 = x.reshape(Bp, W)              # free row-major view

    padded_row_bytes = _round_up(W, 128) * itemsize
    requested = None if batch_tile is None else max(1, int(batch_tile) // g)
    tb = _derive_rows_per_block(Bp, padded_row_bytes, mult, requested)
    f_chunk = _pick_field_chunk(F, E, tb)

    # VMEM budget: double-buffered input/output blocks + bounded f32 temps.
    # Only override the scoped-VMEM default when we actually need more than
    # v5e's 16 MiB default; 32 MiB is valid on v5e / v6e / v7x.
    in_block = _round_up(tb, mult) * _round_up(W, 128) * itemsize
    out_block = _round_up(tb, mult) * _round_up(out_w, 128) * itemsize
    temp_bytes = 4 * _round_up(tb, 8) * min(f_chunk * E, W) * 4
    need = 2 * (in_block + out_block) + temp_bytes
    cparams = dict(dimension_semantics=("parallel",))
    if need > (12 << 20):
        cparams["vmem_limit_bytes"] = 32 << 20

    cost = pl.CostEstimate(
        flops=3 * B * F * E + 3 * B * E,
        transcendentals=0,
        bytes_accessed=B * F * E * itemsize + B * E * itemsize,
    )

    out = pl.pallas_call(
        _make_fm_kernel(F, E, g, f_chunk),
        out_shape=jax.ShapeDtypeStruct((Bp, out_w), x.dtype),
        grid_spec=pltpu.PrefetchScalarGridSpec(
            num_scalar_prefetch=0,
            grid=(pl.cdiv(Bp, tb),),
            in_specs=[pl.BlockSpec((tb, W), lambda i: (i, 0))],
            out_specs=pl.BlockSpec((tb, out_w), lambda i: (i, 0)),
        ),
        compiler_params=pltpu.CompilerParams(**cparams),
        cost_estimate=cost,
    )(x2)
    return out.reshape(B, E)           # free row-major view


def fm_reference(x):
    """Plain-JAX reference mirroring the PyTorch code line-by-line (f32 accum)."""
    xf = x.astype(jnp.float32)
    square_of_sum = jnp.sum(xf, axis=1, keepdims=True) ** 2   # (B,1,E)
    sum_of_square = jnp.sum(xf * xf, axis=1, keepdims=True)   # (B,1,E)
    cross = square_of_sum - sum_of_square                     # (B,1,E)
    return 0.5 * jnp.sum(cross, axis=1)                       # (B,E)


if __name__ == "__main__":
    key = jax.random.PRNGKey(0)
    k1, k2, k3, k4, k5 = jax.random.split(key, 5)

    # Case 1: f32, E | 128 -> packed lane-dense path, 2-step grid.
    x1 = jax.random.normal(k1, (64, 8, 32), dtype=jnp.float32)
    out1 = jax.block_until_ready(fm_forward(x1, batch_tile=32))
    assert out1.shape == (64, 32), out1.shape
    assert jnp.allclose(out1, fm_reference(x1), atol=1e-4, rtol=1e-5), "case1"

    # Case 2: bf16 input (half the HBM traffic), f32 accumulation in-kernel.
    x2 = jax.random.normal(k2, (32, 8, 64), dtype=jnp.float32).astype(jnp.bfloat16)
    out2 = jax.block_until_ready(fm_forward(x2))
    assert out2.dtype == jnp.bfloat16
    assert jnp.allclose(out2.astype(jnp.float32), fm_reference(x2),
                        atol=0.05, rtol=0.02), "case2"

    # Case 3: E doesn't divide 128 -> g=1 fallback, partial last grid block.
    x3 = jax.random.normal(k3, (10, 5, 24), dtype=jnp.float32)
    out3 = jax.block_until_ready(fm_forward(x3, batch_tile=8))
    assert out3.shape == (10, 24), out3.shape
    assert jnp.allclose(out3, fm_reference(x3), atol=1e-4, rtol=1e-5), "case3"

    # Case 4: odd field count with packing -> unaligned group offsets + odd fold.
    x4 = jax.random.normal(k4, (32, 5, 32), dtype=jnp.float32)
    out4 = jax.block_until_ready(fm_forward(x4))
    assert out4.shape == (32, 32), out4.shape
    assert jnp.allclose(out4, fm_reference(x4), atol=1e-4, rtol=1e-5), "case4"

    # Case 5: larger field count -> multi-chunk field accumulation.
    x5 = jax.random.normal(k5, (16, 40, 16), dtype=jnp.float32)
    out5 = jax.block_until_ready(fm_forward(x5))
    assert out5.shape == (16, 16), out5.shape
    assert jnp.allclose(out5, fm_reference(x5), atol=1e-4, rtol=1e-5), "case5"

    print("KERNEL_OK")
</pallas_src>

<mosaic_0001>
module attributes {stable_mosaic.version = 11 : i64} {
  func.func @kernel(%arg0: i32, %arg1: memref<8x1024xf32, #tpu.memory_space<vmem>>, %arg2: memref<8x128xf32, #tpu.memory_space<vmem>>) attributes {dimension_semantics = [#tpu.dimension_semantics<parallel>], iteration_bounds = array<i64: 2>, scalar_prefetch = 0 : i64, scratch_operands = 0 : i64, tpu.core_type = #tpu.core_type<tc>, window_params = [{transform_indices = @transform_0, window_bounds = array<i64: 8, 1024>}, {transform_indices = @transform_1, window_bounds = array<i64: 8, 128>}]} {
    %c0 = arith.constant 0 : index
    %c0_0 = arith.constant 0 : index
    %0 = vector.load %arg1[%c0, %c0_0] : memref<8x1024xf32, #tpu.memory_space<vmem>>, vector<8x256xf32>
    %1 = vector.extract_strided_slice %0 {offsets = [0, 0], sizes = [8, 128], strides = [1, 1]} : vector<8x256xf32> to vector<8x128xf32>
    %2 = vector.extract_strided_slice %0 {offsets = [0, 128], sizes = [8, 128], strides = [1, 1]} : vector<8x256xf32> to vector<8x128xf32>
    %3 = arith.addf %1, %2 : vector<8x128xf32>
    %4 = vector.extract_strided_slice %3 {offsets = [0, 0], sizes = [8, 64], strides = [1, 1]} : vector<8x128xf32> to vector<8x64xf32>
    %5 = vector.extract_strided_slice %3 {offsets = [0, 64], sizes = [8, 64], strides = [1, 1]} : vector<8x128xf32> to vector<8x64xf32>
    %6 = arith.addf %4, %5 : vector<8x64xf32>
    %7 = vector.extract_strided_slice %6 {offsets = [0, 0], sizes = [8, 32], strides = [1, 1]} : vector<8x64xf32> to vector<8x32xf32>
    %8 = vector.extract_strided_slice %6 {offsets = [0, 32], sizes = [8, 32], strides = [1, 1]} : vector<8x64xf32> to vector<8x32xf32>
    %9 = arith.addf %7, %8 : vector<8x32xf32>
    %10 = arith.mulf %0, %0 : vector<8x256xf32>
    %11 = vector.extract_strided_slice %10 {offsets = [0, 0], sizes = [8, 128], strides = [1, 1]} : vector<8x256xf32> to vector<8x128xf32>
    %12 = vector.extract_strided_slice %10 {offsets = [0, 128], sizes = [8, 128], strides = [1, 1]} : vector<8x256xf32> to vector<8x128xf32>
    %13 = arith.addf %11, %12 : vector<8x128xf32>
    %14 = vector.extract_strided_slice %13 {offsets = [0, 0], sizes = [8, 64], strides = [1, 1]} : vector<8x128xf32> to vector<8x64xf32>
    %15 = vector.extract_strided_slice %13 {offsets = [0, 64], sizes = [8, 64], strides = [1, 1]} : vector<8x128xf32> to vector<8x64xf32>
    %16 = arith.addf %14, %15 : vector<8x64xf32>
    %17 = vector.extract_strided_slice %16 {offsets = [0, 0], sizes = [8, 32], strides = [1, 1]} : vector<8x64xf32> to vector<8x32xf32>
    %18 = vector.extract_strided_slice %16 {offsets = [0, 32], sizes = [8, 32], strides = [1, 1]} : vector<8x64xf32> to vector<8x32xf32>
    %19 = arith.addf %17, %18 : vector<8x32xf32>
    %20 = arith.mulf %9, %9 : vector<8x32xf32>
    %21 = arith.subf %20, %19 : vector<8x32xf32>
    %cst = arith.constant 5.000000e-01 : f32
    %22 = vector.broadcast %cst : f32 to vector<8x32xf32>
    %23 = arith.mulf %22, %21 : vector<8x32xf32>
    %c0_1 = arith.constant 0 : index
    %c0_2 = arith.constant 0 : index
    %24 = vector.load %arg2[%c0_1, %c0_2] : memref<8x128xf32, #tpu.memory_space<vmem>>, vector<8x32xf32>
    tpu.vector_store %arg2[%c0_1, %c0_2], %23 {strides = array<i32>} : memref<8x128xf32, #tpu.memory_space<vmem>>, vector<8x32xf32>,
    %c0_3 = arith.constant 0 : index
    %c256 = arith.constant 256 : index
    %25 = vector.load %arg1[%c0_3, %c256] : memref<8x1024xf32, #tpu.memory_space<vmem>>, vector<8x256xf32>
    %26 = vector.extract_strided_slice %25 {offsets = [0, 0], sizes = [8, 128], strides = [1, 1]} : vector<8x256xf32> to vector<8x128xf32>
    %27 = vector.extract_strided_slice %25 {offsets = [0, 128], sizes = [8, 128], strides = [1, 1]} : vector<8x256xf32> to vector<8x128xf32>
    %28 = arith.addf %26, %27 : vector<8x128xf32>
    %29 = vector.extract_strided_slice %28 {offsets = [0, 0], sizes = [8, 64], strides = [1, 1]} : vector<8x128xf32> to vector<8x64xf32>
    %30 = vector.extract_strided_slice %28 {offsets = [0, 64], sizes = [8, 64], strides = [1, 1]} : vector<8x128xf32> to vector<8x64xf32>
    %31 = arith.addf %29, %30 : vector<8x64xf32>
    %32 = vector.extract_strided_slice %31 {offsets = [0, 0], sizes = [8, 32], strides = [1, 1]} : vector<8x64xf32> to vector<8x32xf32>
    %33 = vector.extract_strided_slice %31 {offsets = [0, 32], sizes = [8, 32], strides = [1, 1]} : vector<8x64xf32> to vector<8x32xf32>
    %34 = arith.addf %32, %33 : vector<8x32xf32>
    %35 = arith.mulf %25, %25 : vector<8x256xf32>
    %36 = vector.extract_strided_slice %35 {offsets = [0, 0], sizes = [8, 128], strides = [1, 1]} : vector<8x256xf32> to vector<8x128xf32>
    %37 = vector.extract_strided_slice %35 {offsets = [0, 128], sizes = [8, 128], strides = [1, 1]} : vector<8x256xf32> to vector<8x128xf32>
    %38 = arith.addf %36, %37 : vector<8x128xf32>
    %39 = vector.extract_strided_slice %38 {offsets = [0, 0], sizes = [8, 64], strides = [1, 1]} : vector<8x128xf32> to vector<8x64xf32>
    %40 = vector.extract_strided_slice %38 {offsets = [0, 64], sizes = [8, 64], strides = [1, 1]} : vector<8x128xf32> to vector<8x64xf32>
    %41 = arith.addf %39, %40 : vector<8x64xf32>
    %42 = vector.extract_strided_slice %41 {offsets = [0, 0], sizes = [8, 32], strides = [1, 1]} : vector<8x64xf32> to vector<8x32xf32>
    %43 = vector.extract_strided_slice %41 {offsets = [0, 32], sizes = [8, 32], strides = [1, 1]} : vector<8x64xf32> to vector<8x32xf32>
    %44 = arith.addf %42, %43 : vector<8x32xf32>
    %45 = arith.mulf %34, %34 : vector<8x32xf32>
    %46 = arith.subf %45, %44 : vector<8x32xf32>
    %cst_4 = arith.constant 5.000000e-01 : f32
    %47 = vector.broadcast %cst_4 : f32 to vector<8x32xf32>
    %48 = arith.mulf %47, %46 : vector<8x32xf32>
    %c0_5 = arith.constant 0 : index
    %c32 = arith.constant 32 : index
    %49 = vector.load %arg2[%c0_5, %c32] : memref<8x128xf32, #tpu.memory_space<vmem>>, vector<8x32xf32>
    tpu.vector_store %arg2[%c0_5, %c32], %48 {strides = array<i32>} : memref<8x128xf32, #tpu.memory_space<vmem>>, vector<8x32xf32>,
    %c0_6 = arith.constant 0 : index
    %c512 = arith.constant 512 : index
    %50 = vector.load %arg1[%c0_6, %c512] : memref<8x1024xf32, #tpu.memory_space<vmem>>, vector<8x256xf32>
    %51 = vector.extract_strided_slice %50 {offsets = [0, 0], sizes = [8, 128], strides = [1, 1]} : vector<8x256xf32> to vector<8x128xf32>
    %52 = vector.extract_strided_slice %50 {offsets = [0, 128], sizes = [8, 128], strides = [1, 1]} : vector<8x256xf32> to vector<8x128xf32>
    %53 = arith.addf %51, %52 : vector<8x128xf32>
    %54 = vector.extract_strided_slice %53 {offsets = [0, 0], sizes = [8, 64], strides = [1, 1]} : vector<8x128xf32> to vector<8x64xf32>
    %55 = vector.extract_strided_slice %53 {offsets = [0, 64], sizes = [8, 64], strides = [1, 1]} : vector<8x128xf32> to vector<8x64xf32>
    %56 = arith.addf %54, %55 : vector<8x64xf32>
    %57 = vector.extract_strided_slice %56 {offsets = [0, 0], sizes = [8, 32], strides = [1, 1]} : vector<8x64xf32> to vector<8x32xf32>
    %58 = vector.extract_strided_slice %56 {offsets = [0, 32], sizes = [8, 32], strides = [1, 1]} : vector<8x64xf32> to vector<8x32xf32>
    %59 = arith.addf %57, %58 : vector<8x32xf32>
    %60 = arith.mulf %50, %50 : vector<8x256xf32>
    %61 = vector.extract_strided_slice %60 {offsets = [0, 0], sizes = [8, 128], strides = [1, 1]} : vector<8x256xf32> to vector<8x128xf32>
    %62 = vector.extract_strided_slice %60 {offsets = [0, 128], sizes = [8, 128], strides = [1, 1]} : vector<8x256xf32> to vector<8x128xf32>
    %63 = arith.addf %61, %62 : vector<8x128xf32>
    %64 = vector.extract_strided_slice %63 {offsets = [0, 0], sizes = [8, 64], strides = [1, 1]} : vector<8x128xf32> to vector<8x64xf32>
    %65 = vector.extract_strided_slice %63 {offsets = [0, 64], sizes = [8, 64], strides = [1, 1]} : vector<8x128xf32> to vector<8x64xf32>
    %66 = arith.addf %64, %65 : vector<8x64xf32>
    %67 = vector.extract_strided_slice %66 {offsets = [0, 0], sizes = [8, 32], strides = [1, 1]} : vector<8x64xf32> to vector<8x32xf32>
    %68 = vector.extract_strided_slice %66 {offsets = [0, 32], sizes = [8, 32], strides = [1, 1]} : vector<8x64xf32> to vector<8x32xf32>
    %69 = arith.addf %67, %68 : vector<8x32xf32>
    %70 = arith.mulf %59, %59 : vector<8x32xf32>
    %71 = arith.subf %70, %69 : vector<8x32xf32>
    %cst_7 = arith.constant 5.000000e-01 : f32
    %72 = vector.broadcast %cst_7 : f32 to vector<8x32xf32>
    %73 = arith.mulf %72, %71 : vector<8x32xf32>
    %c0_8 = arith.constant 0 : index
    %c64 = arith.constant 64 : index
    %74 = vector.load %arg2[%c0_8, %c64] : memref<8x128xf32, #tpu.memory_space<vmem>>, vector<8x32xf32>
    tpu.vector_store %arg2[%c0_8, %c64], %73 {strides = array<i32>} : memref<8x128xf32, #tpu.memory_space<vmem>>, vector<8x32xf32>,
    %c0_9 = arith.constant 0 : index
    %c768 = arith.constant 768 : index
    %75 = vector.load %arg1[%c0_9, %c768] : memref<8x1024xf32, #tpu.memory_space<vmem>>, vector<8x256xf32>
    %76 = vector.extract_strided_slice %75 {offsets = [0, 0], sizes = [8, 128], strides = [1, 1]} : vector<8x256xf32> to vector<8x128xf32>
    %77 = vector.extract_strided_slice %75 {offsets = [0, 128], sizes = [8, 128], strides = [1, 1]} : vector<8x256xf32> to vector<8x128xf32>
    %78 = arith.addf %76, %77 : vector<8x128xf32>
    %79 = vector.extract_strided_slice %78 {offsets = [0, 0], sizes = [8, 64], strides = [1, 1]} : vector<8x128xf32> to vector<8x64xf32>
    %80 = vector.extract_strided_slice %78 {offsets = [0, 64], sizes = [8, 64], strides = [1, 1]} : vector<8x128xf32> to vector<8x64xf32>
    %81 = arith.addf %79, %80 : vector<8x64xf32>
    %82 = vector.extract_strided_slice %81 {offsets = [0, 0], sizes = [8, 32], strides = [1, 1]} : vector<8x64xf32> to vector<8x32xf32>
    %83 = vector.extract_strided_slice %81 {offsets = [0, 32], sizes = [8, 32], strides = [1, 1]} : vector<8x64xf32> to vector<8x32xf32>
    %84 = arith.addf %82, %83 : vector<8x32xf32>
    %85 = arith.mulf %75, %75 : vector<8x256xf32>
    %86 = vector.extract_strided_slice %85 {offsets = [0, 0], sizes = [8, 128], strides = [1, 1]} : vector<8x256xf32> to vector<8x128xf32>
    %87 = vector.extract_strided_slice %85 {offsets = [0, 128], sizes = [8, 128], strides = [1, 1]} : vector<8x256xf32> to vector<8x128xf32>
    %88 = arith.addf %86, %87 : vector<8x128xf32>
    %89 = vector.extract_strided_slice %88 {offsets = [0, 0], sizes = [8, 64], strides = [1, 1]} : vector<8x128xf32> to vector<8x64xf32>
    %90 = vector.extract_strided_slice %88 {offsets = [0, 64], sizes = [8, 64], strides = [1, 1]} : vector<8x128xf32> to vector<8x64xf32>
    %91 = arith.addf %89, %90 : vector<8x64xf32>
    %92 = vector.extract_strided_slice %91 {offsets = [0, 0], sizes = [8, 32], strides = [1, 1]} : vector<8x64xf32> to vector<8x32xf32>
    %93 = vector.extract_strided_slice %91 {offsets = [0, 32], sizes = [8, 32], strides = [1, 1]} : vector<8x64xf32> to vector<8x32xf32>
    %94 = arith.addf %92, %93 : vector<8x32xf32>
    %95 = arith.mulf %84, %84 : vector<8x32xf32>
    %96 = arith.subf %95, %94 : vector<8x32xf32>
    %cst_10 = arith.constant 5.000000e-01 : f32
    %97 = vector.broadcast %cst_10 : f32 to vector<8x32xf32>
    %98 = arith.mulf %97, %96 : vector<8x32xf32>
    %c0_11 = arith.constant 0 : index
    %c96 = arith.constant 96 : index
    %99 = vector.load %arg2[%c0_11, %c96] : memref<8x128xf32, #tpu.memory_space<vmem>>, vector<8x32xf32>
    tpu.vector_store %arg2[%c0_11, %c96], %98 {strides = array<i32>} : memref<8x128xf32, #tpu.memory_space<vmem>>, vector<8x32xf32>,
    return
  }
  func.func @transform_0(%arg0: i32) -> (i32, i32) {
    %c0_i32 = arith.constant 0 : i32
    %c0_i32_0 = arith.constant 0 : i32
    return %arg0, %c0_i32 : i32, i32
  }
  func.func @transform_1(%arg0: i32) -> (i32, i32) {
    %c0_i32 = arith.constant 0 : i32
    %c0_i32_0 = arith.constant 0 : i32
    return %arg0, %c0_i32 : i32, i32
  }
}

</mosaic_0001>

<bundles_post_ra>
// kernel: tpu_custom_call.1
= control target key start
LH: loop header
LB: loop body
LE: loop exit
PB: predicated region body
PF: predicated region fallthrough
CT: control target
= control target key end

     0   :  { %6 = vsyncpa [#allocation3], 0  ;;  %s709_s0 = inlined_call_operand.hbm [shape: f32[16,1024], index: 0, kind: input, shape index: {}]   ;;  %s710_s1 = inlined_call_operand.hbm [shape: f32[16,128], index: 1, kind: output, shape index: {}]  }
   0x1   :  { %8 = vsyncpa [#allocation3 + $0x1], 0 }
   0x2   :  { %9 = vsyncpa [#allocation4], 0 }
   0x3   :  { %11 = vsyncpa [#allocation4 + $0x1], 0  ;;  %s529_s6 = smov 0   ;;  %s531_s7 = smov 0  }
   0x4   :  { %s533_s8 = smov 0   ;;  %s535_s9 = smov 0  }
   0x5 LB: > { %s550_s10 = sadd.s32 4294967295, %s512_s9   ;;  %s353_s11 = sadd.s32 4294967294, %s512_s9   ;;  %s512_s9 = sphi %s535_s9, %s725_s9   ;;  %s508_s8 = sphi %s533_s8, %s724_s8   ;;  %s504_s7 = sphi %s531_s7, %s723_s7   ;;  %s500_s6 = sphi %s529_s6, %s722_s6  }
   0x6   : > { %s554_s12 = sadd.s32 1, %s512_s9   ;;  %s24_s13 = sadd.s32 1, %s508_s8 }
   0x7   : > { %s21_s14 = ssub.s32 %s512_s9, %s554_s12  ;;  %p31_p0 = scmp.ne.s32.totalorder %s508_s8, %s504_s7 }
   0x8   : > { %p22_p1 = scmp.eq.s32.totalorder %s21_s14, 0  ;;  %p32_p2 = scmp.eq.s32.totalorder %s512_s9, 0 }
   0x9   : > { %p37_p3 = scmp.ne.s32.totalorder %s504_s7, %s500_s6  ;;  %p38_p4 = scmp.eq.s32.totalorder %s550_s10, 0 }
   0xa   : > { %s566_s15 = scalar_select %p22_p1, %s508_s8, %s24_s13  }
   0xb   : > { %p568_p5 = por %p32_p2, %p31_p0  ;;  %p572_p6 = por %p38_p4, %p37_p3 }
   0xc   : > { %p61_p7 = scmp.eq.s32.totalorder %s550_s10, 1  ;;  %p67_p8 = scmp.eq.s32.totalorder %s353_s11, 1 }
   0xd   : > { %p379_p10 = scmp.lt.s32.totalorder %s512_s9, 2  ;;  %s87_s20 = sand.u32 1, %s508_s8  }
   0xe   : > { %p579_p11 = por %p61_p7, %p31_p0  ;;  %p583_p12 = por %p67_p8, %p37_p3 }
   0xf   : > { %s366_s21 = sshll.u32 %s512_s9, 10  ;;  %s356_s22 = sshll.u32 %s87_s20, 6 }
  0x10   : > { %s714_s18 = scalar_select %p579_p11, 1, 0 }
  0x11   : > { %s715_s19 = scalar_select %p583_p12, 1, 0 }
  0x12   : > { %s592_s25 = scalar_lea.hbm %s709_s0, %s366_s21  ;;  %s91_s26 = scalar_lea.vmem [#allocation2], %s356_s22 }
  0x13   : > { %s99_s27 = sshll.u32 %s91_s26, 4  ;;  %p596_p13 = pnand %p379_p10, %p568_p5  ;;  %s600_s27 = int_to_ptr.vmem [resolvable:$true] %s99_s27 }
  0x14   : > { %s88_s29 = scalar_lea.sflag [#allocation3], %s87_s20  ;;  %s416_s30 = scalar_lea.hbm %s592_s25, 1024 }
  0x15   : > { %p417_p2 = scmp.ne.s32.totalorder %s592_s25, %s416_s30  ;;  %p418_p3 = pneg %p596_p13 }
  0x16   : > { %s421_s4 = scalar_lea.hbm %s709_s0, 2048  ;;  %p422_p5 = scmp.lt.u32.totalorder %s592_s25, %s709_s0 }
  0x17   : > { %p419_p4 = pnand %p418_p3, %p417_p2  ;;  %p423_p8 = scmp.lt.u32.totalorder %s421_s4, %s416_s30 }
  0x18   : > { %p425_p9 = scmp.lt.u32.totalorder %s416_s30, %s592_s25 }
  0x19   : > { %p420_p7 = pneg %p419_p4  ;;  %p424_p10 = por %p423_p8, %p422_p5 }
  0x1b   : > { %p426_p0 = por %p425_p9, %p424_p10 }
  0x1d   : > { %p427_p1 = pnand %p426_p0, %p420_p7 }
  0x1f   : > { %430 = shalt.err (!%p427_p1)
}
  0x20   : > { %s431_s13 = scalar_lea.vmem %s600_s27, 1024  ;;  %s514_s14 = smov [#allocation2]  }
  0x21   : > { %p432_p2 = scmp.ne.s32.totalorder %s600_s27, %s431_s13  ;;  %s436_s16 = sshll.u32 %s514_s14, 4  ;;  %s437_s16 = int_to_ptr.vmem [resolvable:$false] %s436_s16 }
  0x22   : > { %s438_s20 = scalar_lea.vmem %s437_s16, 2048  ;;  %p439_p11 = scmp.lt.s32.totalorder %s600_s27, %s437_s16 }
  0x23   : > { %p434_p4 = pnand %p432_p2, %p418_p3  ;;  %p440_p5 = scmp.lt.s32.totalorder %s438_s20, %s431_s13 }
  0x25   : > { %p435_p12 = pneg %p434_p4  ;;  %p441_p8 = por %p440_p5, %p439_p11 }
  0x27   : > { %p442_p9 = pnand %p441_p8, %p435_p12 }
  0x29   : > { %445 = shalt.err (!%p442_p9)
}
  0x2a   : > { %374 = dma.hbm_to_vmem [thread:$0]  (!%p596_p13), %s592_s25, 1024, %s600_s27, %s88_s29  }
  0x2b   : > { %p717_p0 = scmp.lt.s32.totalorder %s512_s9, 3  ;;  %p718_p1 = scmp.ge.s32.totalorder %s512_s9, 1 }
  0x2d   : > { %p105_p3 = pnand %p718_p1, %p717_p0 }
  0x2e   : > { %s634_s21 = sand.u32 (!%p105_p3), 1, %s504_s7  }
  0x2f   : > { %108 = sbr.rel (%p105_p3) target bundleno = 438 (0x1b6), region = 24  ;;  %s360_s22 = sshll.u32 (!%p105_p3), %s634_s21, 6 }
  0x30   : > { %s111_s23 = scalar_lea.sflag (!%p105_p3), [#allocation3], %s634_s21  ;;  %s114_s24 = scalar_lea.vmem (!%p105_p3), [#allocation2], %s360_s22 }
  0x36   : > { %491 = dma.done.wait (%p572_p6), %s111_s23, 1024  }
  0x37   : > { %493 = vsyncadd (%p572_p6), %s111_s23, 4294966272  ;;  %v234_v0 = vld [vmem:[%s114_s24 + $0x30] sm:$0xff]  ;;  %v235_v1 = vld [vmem:[%s114_s24 + $0x38] sm:$0xff]  ;;  %s515_s25 = smov 64   ;;  %s516_s17 = smov 96   ;;  %vm162_vm0 = vcmask 261120  }
  0x38   : > { %v164_v2 = vld [vmem:[%s114_s24 + $0x10] sm:$0xff]  ;;  %v236_v3 = vadd.f32 %v235_v1, %v234_v0  ;;  %v165_v4 = vld [vmem:[%s114_s24 + $0x18] sm:$0xff]  ;;  %v199_v6 = vld [vmem:[%s114_s24 + $0x20] sm:$0xff]  ;;  %v247_v10 = vmul.f32 %v234_v0, %v234_v0  ;;  %v248_v11 = vmul.f32 %v235_v1, %v235_v1  ;;  %s517_s26 = smov 32   ;;  %s361_s27 = sshll.u32 %s634_s21, 3  ;;  %vm197_vm1 = vcmask 523520  }
  0x39   : > { %v177_v5 = vmul.f32 %v164_v2, %v164_v2  ;;  %v200_v7 = vld [vmem:[%s114_s24 + $0x28] sm:$0xff]  ;;  %v166_v8 = vadd.f32 %v165_v4, %v164_v2  ;;  %v178_v9 = vmul.f32 %v165_v4, %v165_v4  ;;  %v212_v14 = vmul.f32 %v199_v6, %v199_v6  ;;  %v133_v16 = vld [vmem:[%s114_s24] sm:$0xff]  ;;  %s132_s28 = scalar_lea.vmem [#allocation5], %s361_s27  ;;  %s363_s29 = sshll.u32 %s550_s10, 7 }
  0x3a   : > { %238 = vrot.lane.b32.xlu1 %v236_v3, %s515_s25  ;;  %v201_v13 = vadd.f32 %v200_v7, %v199_v6  ;;  %v213_v15 = vmul.f32 %v200_v7, %v200_v7  ;;  %v134_v17 = vld [vmem:[%s114_s24 + $0x8] sm:$0xff]  ;;  %v249_v18 = vadd.f32 %v248_v11, %v247_v10  ;;  %v146_v19 = vmul.f32 %v133_v16, %v133_v16  ;;  %s283_s30 = sshll.u32 %s132_s28, 4  ;;  %s665_s4 = scalar_lea.hbm %s710_s1, %s363_s29  ;;  %s667_s30 = int_to_ptr.vmem [resolvable:$true] %s283_s30 }
  0x3b   : > { %168 = vrot.lane.b32.xlu0 %v166_v8, %s515_s25  ;;  %v179_v12 = vadd.f32 %v178_v9, %v177_v5  ;;  %v147_v20 = vmul.f32 %v134_v17, %v134_v17  ;;  %v135_v23 = vadd.f32 %v134_v17, %v133_v16  ;;  %vm232_vm2 = vcmask 785920   ;;  %s270_s5 = scalar_lea.sflag [#allocation4], %s634_s21  ;;  %s446_s11 = scalar_lea.vmem %s667_s30, 128 }
  0x3c   : > { %v214_v21 = vadd.f32 %v213_v15, %v212_v14  ;;  %vm267_vm3 = vcmask 1048320   ;;  %p447_p6 = scmp.ne.s32.totalorder %s667_s30, %s446_s11  ;;  %p719_p11 = scmp.ne.s32.totalorder %s714_s18, 0 }
  0x3d   : > { %v148_v22 = vadd.f32 %v147_v20, %v146_v19  ;;  %s518_s10 = smov [#allocation5]  }
  0x3e   : > { %181 = vrot.lane.b32.xlu1 %v179_v12, %s515_s25  ;;  %p448_p12 = pnand %p447_p6, %p719_p11  ;;  %s450_s13 = sshll.u32 %s518_s10, 4  ;;  %s451_s13 = int_to_ptr.vmem [resolvable:$false] %s450_s13 }
  0x3f   : > { %203 = vrot.lane.b32.xlu0 %v201_v13, %s515_s25  ;;  %s452_s14 = scalar_lea.vmem %s451_s13, 256  ;;  %p453_p7 = scmp.lt.s32.totalorder %s667_s30, %s451_s13 }
  0x40   : > { %p449_p13 = pneg %p448_p12  ;;  %p454_p10 = scmp.lt.s32.totalorder %s452_s14, %s446_s11 }
  0x42   : > { %251 = vrot.lane.b32.xlu1 %v249_v18, %s515_s25  ;;  %p455_p2 = por %p454_p10, %p453_p7 }
  0x43   : > { %216 = vrot.lane.b32.xlu0 %v214_v21, %s515_s25 }
  0x44   : > { %p456_p4 = pnand %p455_p2, %p449_p13 }
  0x46   : > { %150 = vrot.lane.b32.xlu1 %v148_v22, %s515_s25 }
  0x47   : > { %137 = vrot.lane.b32.xlu0 %v135_v23, %s515_s25 }
  0xac   : > { %v239_v24 = vpop.permute.xlu1 %238 }
  0xad   : > { %v169_v25 = vpop.permute.xlu0 %168  ;;  %v241_v33 = vadd.f32 %v239_v24, %v236_v3 }
  0xae   : > { %v171_v26 = vadd.f32 %v169_v25, %v166_v8 }
  0xb0   : > { %173 = vrot.lane.b32.xlu0 %v171_v26, %s516_s17  ;;  %v182_v27 = vpop.permute.xlu1 %181 }
  0xb1   : > { %v184_v28 = vadd.f32 %v182_v27, %v179_v12  ;;  %v204_v29 = vpop.permute.xlu0 %203 }
  0xb2   : > { %v206_v30 = vadd.f32 %v204_v29, %v201_v13 }
  0xb4   : > { %208 = vrot.lane.b32.xlu1 %v206_v30, %s516_s17  ;;  %186 = vrot.lane.b32.xlu0 %v184_v28, %s516_s17  ;;  %v252_v31 = vpop.permute.xlu1 %251 }
  0xb5   : > { %v217_v32 = vpop.permute.xlu0 %216  ;;  %v254_v35 = vadd.f32 %v252_v31, %v249_v18 }
  0xb6   : > { %v219_v34 = vadd.f32 %v217_v32, %v214_v21 }
  0xb8   : > { %243 = vrot.lane.b32.xlu1 %v241_v33, %s516_s17  ;;  %221 = vrot.lane.b32.xlu0 %v219_v34, %s516_s17  ;;  %v151_v37 = vpop.permute.xlu1 %150 }
  0xb9   : > { %v138_v36 = vpop.permute.xlu0 %137  ;;  %v153_v39 = vadd.f32 %v151_v37, %v148_v22 }
  0xba   : > { %v140_v38 = vadd.f32 %v138_v36, %v135_v23 }
  0xbc   : > { %256 = vrot.lane.b32.xlu1 %v254_v35, %s516_s17  ;;  %142 = vrot.lane.b32.xlu0 %v140_v38, %s516_s17 }
  0xc0   : > { %155 = vrot.lane.b32.xlu1 %v153_v39, %s516_s17 }
 0x122   : > { %v174_v40 = vpop.permute.xlu0 %173 }
 0x123   : > { %v176_v41 = vadd.f32 %v174_v40, %v171_v26 }
 0x125   : > { %v190_v44 = vmul.f32 %v176_v41, %v176_v41 }
 0x126   : > { %v209_v42 = vpop.permute.xlu1 %208  ;;  %v187_v43 = vpop.permute.xlu0 %186 }
 0x127   : > { %v211_v45 = vadd.f32 %v209_v42, %v206_v30  ;;  %v189_v46 = vadd.f32 %v187_v43, %v184_v28 }
 0x129   : > { %v191_v47 = vsub.f32 %v190_v44, %v189_v46  ;;  %v225_v50 = vmul.f32 %v211_v45, %v211_v45 }
 0x12a   : > { %v244_v48 = vpop.permute.xlu1 %243  ;;  %v222_v49 = vpop.permute.xlu0 %221 }
 0x12b   : > { %v192_v51 = vmul.f32 0.5, %v191_v47  ;;  %v246_v52 = vadd.f32 %v244_v48, %v241_v33  ;;  %v224_v53 = vadd.f32 %v222_v49, %v219_v34 }
 0x12d   : > { %v226_v54 = vsub.f32 %v225_v50, %v224_v53  ;;  %194 = vrot.lane.b32.xlu0 %v192_v51, %s517_s26  ;;  %v260_v57 = vmul.f32 %v246_v52, %v246_v52 }
 0x12e   : > { %v257_v55 = vpop.permute.xlu1 %256  ;;  %v143_v56 = vpop.permute.xlu0 %142 }
 0x12f   : > { %v227_v58 = vmul.f32 0.5, %v226_v54  ;;  %v259_v59 = vadd.f32 %v257_v55, %v254_v35  ;;  %v145_v60 = vadd.f32 %v143_v56, %v140_v38 }
 0x131   : > { %v261_v61 = vsub.f32 %v260_v57, %v259_v59  ;;  %229 = vrot.lane.b32.xlu1 %v227_v58, %s515_s25  ;;  %v159_v0 = vmul.f32 %v145_v60, %v145_v60 }
 0x132   : > { %v156_v62 = vpop.permute.xlu1 %155 }
 0x133   : > { %v262_v63 = vmul.f32 0.5, %v261_v61  ;;  %v158_v1 = vadd.f32 %v156_v62, %v153_v39 }
 0x135   : > { %v160_v2 = vsub.f32 %v159_v0, %v158_v1  ;;  %264 = vrot.lane.b32.xlu0 %v262_v63, %s516_s17 }
 0x137   : > { %v161_v3 = vmul.f32 0.5, %v160_v2 }
 0x139   : > { %163 = vst.msk [vmem:[%s132_s28] sm:$0xff] %vm162_vm0, %v161_v3 }
 0x19f   : > { %v195_v4 = vpop.permute.xlu0 %194 }
 0x1a0   : > { %198 = vst.msk [vmem:[%s132_s28] sm:$0xff] %vm197_vm1, %v195_v4 }
 0x1a3   : > { %v230_v5 = vpop.permute.xlu1 %229 }
 0x1a4   : > { %233 = vst.msk [vmem:[%s132_s28] sm:$0xff] %vm232_vm2, %v230_v5 }
 0x1a7   : > { %v265_v6 = vpop.permute.xlu0 %264 }
 0x1a8   : > { %268 = vst.msk [vmem:[%s132_s28] sm:$0xff] %vm267_vm3, %v265_v6 }
 0x1a9   : > { %459 = shalt.err (!%p456_p4)
}
 0x1aa   : > { %s460_s16 = scalar_lea.hbm %s665_s4, 128  ;;  %s464_s22 = scalar_lea.hbm %s710_s1, 256 }
 0x1ab   : > { %p461_p5 = scmp.ne.s32.totalorder %s665_s4, %s460_s16  ;;  %p465_p0 = scmp.lt.u32.totalorder %s665_s4, %s710_s1 }
 0x1ac   : > { %p466_p1 = scmp.lt.u32.totalorder %s464_s22, %s460_s16  ;;  %p468_p6 = scmp.lt.u32.totalorder %s460_s16, %s665_s4 }
 0x1ad   : > { %p462_p8 = pnand %p461_p5, %p719_p11 }
 0x1ae   : > { %p467_p3 = por %p466_p1, %p465_p0 }
 0x1af   : > { %p463_p9 = pneg %p462_p8 }
 0x1b0   : > { %p469_p12 = por %p468_p6, %p467_p3 }
 0x1b2   : > { %p470_p13 = pnand %p469_p12, %p463_p9 }
 0x1b4   : > { %473 = shalt.err (!%p470_p13)
}
 0x1b5   : > { %369 = dma.vmem_to_hbm [thread:$0]  (%p719_p11), %s667_s30, 128, %s665_s4, %s270_s5  }
 0x1b6 PF: > { %s295_s25 = sand.u32 1, %s500_s6   ;;  %p720_p7 = scmp.ne.s32.totalorder %s715_s19, 0 }
 0x1b7   : > { %p721_p10 = scmp.ge.s32.totalorder %s512_s9, 2  ;;  %s296_s17 = scalar_lea.sflag [#allocation4], %s295_s25 }
 0x1b9   : > { %p376_p2 = pnand %p721_p10, %p720_p7 }
 0x1bb   : > { %495 = dma.done.wait (!%p376_p2), %s296_s17, 128  }
 0x1bc   : > { %497 = vsyncadd (!%p376_p2), %s296_s17, 4294967168  ;;  %p14_p4 = scmp.ge.s32.totalorder %s554_s12, 4   ;;  %s722_s6 = smov %s504_s7 }
 0x1bd   : > { %s723_s7 = smov %s508_s8  ;;  %s724_s8 = smov %s566_s15 }
 0x1be   : > { %s725_s9 = smov %s554_s12  ;;  %16 = sbr.rel (!%p14_p4) target bundleno = 5 (0x5), region = 69 }
 0x1c5   :  { %301 = vsyncpa [#allocation3], 1 }
 0x1c6   :  { %303 = vsyncpa [#allocation3 + $0x1], 1 }
 0x1c7   :  { %304 = vsyncpa [#allocation4], 1 }
 0x1c8   :  { %306 = vsyncpa [#allocation4 + $0x1], 1 }

</bundles_post_ra>
